<compile_context>
chip_gen: v6e
topology: v6e:2x2x1
jax: 0.10.0
libtpu: 0.0.40
codegen_flags: <defaults>
</compile_context>

<pallas_src>
import jax
import jax.numpy as jnp
from jax.experimental import pallas as pl
from jax.experimental.pallas import tpu as pltpu

EPS = 1e-5                     # PyTorch InstanceNorm2d default (affine=False, biased var)
VMEM_BUDGET = 24 << 20         # target working set (fits default 32 MiB scoped VMEM)


def _make_kernel(TP, nP, P, eps, add_activation):
    """Kernel closure for given P-tile size / count (all Python-static)."""

    def _finish(y, mean):
        var = jnp.sum((y - mean) ** 2, axis=-1, keepdims=True) / P
        out = (y - mean) * jax.lax.rsqrt(var + eps)
        if add_activation:
            out = jnp.maximum(out, 0.0)
        return out

    def kernel(p_ref, w_ref, o_ref, sum_ref):
        # p_ref  : (1, CKK, TP)  bf16 im2col patch tile for one image
        # w_ref  : (TCo, CKK)    bf16 flattened conv-weight tile (VMEM resident)
        # o_ref  : (1, TCo, P)   f32 output block, resident across the P-tile axis
        # sum_ref: (TCo, 1)      f32 running per-channel sum (mean pass)
        pt = pl.program_id(2)

        # Convolution as matmul on the MXU, f32 accumulation, lane-dense in P.
        acc = jnp.dot(w_ref[...], p_ref[0],
                      preferred_element_type=jnp.float32)          # (TCo, TP)

        if nP == 1:
            # Single tile: normalize directly, no VMEM round-trip.
            mean = jnp.sum(acc, axis=-1, keepdims=True) / P
            o_ref[0] = _finish(acc, mean)
        else:
            @pl.when(pt == 0)
            def _():
                sum_ref[...] = jnp.zeros_like(sum_ref)

            # Mean pass overlaps the matmul stream (XLU reduction, MXU otherwise busy).
            sum_ref[...] += jnp.sum(acc, axis=-1, keepdims=True)

            start = pl.multiple_of(pt * TP, 128)                   # unmasked stores
            o_ref[0, :, pl.ds(start, TP)] = acc

            @pl.when(pt == nP - 1)
            def _():
                # Whole conv output for this (image, channel-tile) is resident in
                # VMEM: exact two-pass InstanceNorm + ReLU, in place.
                mean = sum_ref[...] / P
                o_ref[0] = _finish(o_ref[0], mean)

    return kernel


def _im2col_ckk_p(x_pad, K, stride, Ho, Wo):
    """(N, C, Hp, Wp) -> (N, C*K*K, Ho*Wo) with (c, ki, kj) tap ordering.

    Only strided slices, a stack on a new middle axis and a reshape (no transposes).
    """
    N, C, _, _ = x_pad.shape
    taps = []
    for ki in range(K):
        for kj in range(K):
            taps.append(x_pad[:, :, ki:ki + stride * Ho:stride,
                                    kj:kj + stride * Wo:stride])    # (N, C, Ho, Wo)
    p = jnp.stack(taps, axis=2)                                     # (N, C, K*K, Ho, Wo)
    return p.reshape(N, C * K * K, Ho * Wo)                         # (N, CKK, P)


def _pick_tco(C_out, P, out_budget_bytes):
    """Channel tile: full C_out unless the resident f32 output block busts the budget.

    Per-channel InstanceNorm is independent across channels, so splitting C_out on
    the grid is exact; tile must be a multiple of 8 (sublane) or the full extent.
    """
    if C_out % 8 != 0 or C_out * P * 4 <= out_budget_bytes:
        return C_out, 1
    best = None
    for d in range(8, C_out + 1, 8):
        if C_out % d == 0 and d * P * 4 <= out_budget_bytes:
            best = d
    if best is None:
        best = 8                       # smallest aligned divisor; accept slight overshoot
    return best, C_out // best


def _pick_tp(P, CKK, budget_bytes):
    """P tile: multiple of 128 dividing P, sized for double-buffered bf16 patches.

    Falls back to TP = P (full extent) when P is not a multiple of 128.
    """
    if P % 128 != 0:
        return P, 1
    max_tp = max(128, budget_bytes // (2 * CKK * 2))   # 2 buffers x bf16
    cap = min(max_tp, 4096)
    best = 128                                         # always divides P here
    d = 256
    while d <= min(P, cap):
        if P % d == 0:
            best = d
        d += 128
    return best, P // best


def downsampling_conv_block(x, weight, bias=None, *, stride=2, padding=1,
                            add_activation=True):
    """x: (N, C_in, H, W) f32. weight: (C_out, C_in, K, K). bias: (C_out,) or None.

    NOTE: the conv bias is a per-channel constant removed exactly by InstanceNorm's
    mean subtraction (affine=False), so it is intentionally unused.
    """
    del bias
    N, C_in, H, W = x.shape
    C_out, _, K, _ = weight.shape

    Ho = (H + 2 * padding - K) // stride + 1
    Wo = (W + 2 * padding - K) // stride + 1
    P = Ho * Wo
    CKK = C_in * K * K

    # Reflect padding (PyTorch padding_mode='reflect'); cast early so the patch
    # materialization is bf16 (halves HBM traffic into the kernel).
    xb = x.astype(jnp.bfloat16)
    x_pad = jnp.pad(xb, ((0, 0), (0, 0), (padding, padding), (padding, padding)),
                    mode="reflect")

    patches = _im2col_ckk_p(x_pad, K, stride, Ho, Wo)              # (N, CKK, P) bf16
    w_flat = weight.reshape(C_out, CKK).astype(jnp.bfloat16)       # (C_out, CKK) bf16

    TCo, nCo = _pick_tco(C_out, P, VMEM_BUDGET // 2)
    patch_budget = max(1 << 20, VMEM_BUDGET - TCo * P * 4 - TCo * CKK * 2)
    TP, nP = _pick_tp(P, CKK, patch_budget)

    kernel = _make_kernel(TP, nP, P, EPS, add_activation)

    cp_kwargs = dict(dimension_semantics=("parallel", "parallel", "arbitrary"))
    vmem_need = 2 * TCo * P * 4 + 4 * CKK * TP + 2 * TCo * CKK * 2 + (1 << 20)
    if vmem_need > (32 << 20):
        cp_kwargs["vmem_limit_bytes"] = int(min(vmem_need, 64 << 20))

    out = pl.pallas_call(
        kernel,
        out_shape=jax.ShapeDtypeStruct((N, C_out, P), jnp.float32),
        grid_spec=pltpu.PrefetchScalarGridSpec(
            num_scalar_prefetch=0,
            grid=(N, nCo, nP),
            in_specs=[
                pl.BlockSpec((1, CKK, TP), lambda n, co, p: (n, 0, p)),
                pl.BlockSpec((TCo, CKK), lambda n, co, p: (co, 0)),  # weight: resident
            ],
            out_specs=pl.BlockSpec((1, TCo, P), lambda n, co, p: (n, co, 0)),
            scratch_shapes=[pltpu.VMEM((TCo, 1), jnp.float32)],
        ),
        compiler_params=pltpu.CompilerParams(**cp_kwargs),
    )(patches, w_flat)

    # (N, C_out, P) -> (N, C_out, Ho, Wo): pure reshape, no transpose.
    return out.reshape(N, C_out, Ho, Wo)


if __name__ == "__main__":
    # Small deterministic example consistent with the module.
    N, C_in, H, W = 2, 4, 16, 16
    C_out, K = 8, 3

    key = jax.random.PRNGKey(0)
    kx, kw, kb = jax.random.split(key, 3)
    x = jax.random.normal(kx, (N, C_in, H, W), dtype=jnp.float32)
    weight = jax.random.normal(kw, (C_out, C_in, K, K), dtype=jnp.float32) * 0.1
    bias = jax.random.normal(kb, (C_out,), dtype=jnp.float32) * 0.1

    out = downsampling_conv_block(x, weight, bias, stride=2, padding=1)
    jax.block_until_ready(out)
    assert out.shape == (N, C_out, H // 2, W // 2), out.shape
    print("KERNEL_OK")
</pallas_src>

<mosaic_0001>
module attributes {stable_mosaic.version = 11 : i64} {
  func.func @kernel(%arg0: i32, %arg1: i32, %arg2: i32, %arg3: memref<1x36x64xbf16, #tpu.memory_space<vmem>>, %arg4: memref<8x36xbf16, #tpu.memory_space<vmem>>, %arg5: memref<1x8x64xf32, #tpu.memory_space<vmem>>, %arg6: memref<8x1xf32, #tpu.memory_space<vmem>>) attributes {dimension_semantics = [#tpu.dimension_semantics<parallel>, #tpu.dimension_semantics<parallel>, #tpu.dimension_semantics<arbitrary>], iteration_bounds = array<i64: 2, 1, 1>, scalar_prefetch = 0 : i64, scratch_operands = 1 : i64, tpu.core_type = #tpu.core_type<tc>, window_params = [{transform_indices = @transform_0, window_bounds = array<i64: 1, 36, 64>}, {transform_indices = @transform_1, window_bounds = array<i64: 8, 36>}, {transform_indices = @transform_2, window_bounds = array<i64: 1, 8, 64>}]} {
    %c0 = arith.constant 0 : index
    %c0_0 = arith.constant 0 : index
    %0 = vector.load %arg4[%c0, %c0_0] : memref<8x36xbf16, #tpu.memory_space<vmem>>, vector<8x36xbf16>
    %c0_1 = arith.constant 0 : index
    %c0_2 = arith.constant 0 : index
    %c0_3 = arith.constant 0 : index
    %1 = vector.load %arg3[%c0_1, %c0_2, %c0_3] : memref<1x36x64xbf16, #tpu.memory_space<vmem>>, vector<1x36x64xbf16>
    %2 = vector.shape_cast %1 : vector<1x36x64xbf16> to vector<36x64xbf16>
    %cst = arith.constant dense<0.000000e+00> : vector<8x64xf32>
    %3 = tpu.matmul %0, %2, %cst {dimension_numbers = #tpu.dot_dimension_numbers<[1], [0], [0], [1], [0, 0, 1, 1], [], []>} : vector<8x36xbf16>, vector<36x64xbf16>, vector<8x64xf32> -> vector<8x64xf32>
    %cst_4 = arith.constant dense<0.000000e+00> : vector<8xf32>
    %4 = vector.multi_reduction <add>, %3, %cst_4 [1] : vector<8x64xf32> to vector<8xf32>
    %5 = vector.shape_cast %4 : vector<8xf32> to vector<8x1xf32>
    %cst_5 = arith.constant 6.400000e+01 : f32
    %6 = vector.broadcast %cst_5 : f32 to vector<8x1xf32>
    %7 = arith.divf %5, %6 : vector<8x1xf32>
    %8 = vector.broadcast %7 : vector<8x1xf32> to vector<8x64xf32>
    %9 = arith.subf %3, %8 : vector<8x64xf32>
    %10 = arith.mulf %9, %9 : vector<8x64xf32>
    %cst_6 = arith.constant dense<0.000000e+00> : vector<8xf32>
    %11 = vector.multi_reduction <add>, %10, %cst_6 [1] : vector<8x64xf32> to vector<8xf32>
    %12 = vector.shape_cast %11 : vector<8xf32> to vector<8x1xf32>
    %cst_7 = arith.constant 6.400000e+01 : f32
    %13 = vector.broadcast %cst_7 : f32 to vector<8x1xf32>
    %14 = arith.divf %12, %13 : vector<8x1xf32>
    %15 = vector.broadcast %7 : vector<8x1xf32> to vector<8x64xf32>
    %16 = arith.subf %3, %15 : vector<8x64xf32>
    %cst_8 = arith.constant 9.99999974E-6 : f32
    %17 = vector.broadcast %cst_8 : f32 to vector<8x1xf32>
    %18 = arith.addf %14, %17 : vector<8x1xf32>
    %19 = math.rsqrt %18 : vector<8x1xf32>
    %20 = vector.broadcast %19 : vector<8x1xf32> to vector<8x64xf32>
    %21 = arith.mulf %16, %20 : vector<8x64xf32>
    %cst_9 = arith.constant 0.000000e+00 : f32
    %22 = vector.broadcast %cst_9 : f32 to vector<8x64xf32>
    %23 = arith.maximumf %21, %22 : vector<8x64xf32>
    %c0_10 = arith.constant 0 : index
    %c0_11 = arith.constant 0 : index
    %c0_12 = arith.constant 0 : index
    %24 = vector.load %arg5[%c0_10, %c0_11, %c0_12] : memref<1x8x64xf32, #tpu.memory_space<vmem>>, vector<1x8x64xf32>
    %25 = vector.shape_cast %24 : vector<1x8x64xf32> to vector<8x64xf32>
    %26 = vector.shape_cast %23 : vector<8x64xf32> to vector<1x8x64xf32>
    tpu.vector_store %arg5[%c0_10, %c0_11, %c0_12], %26 {strides = array<i32>} : memref<1x8x64xf32, #tpu.memory_space<vmem>>, vector<1x8x64xf32>,
    return
  }
  func.func @transform_0(%arg0: i32, %arg1: i32, %arg2: i32) -> (i32, i32, i32) {
    %c0_i32 = arith.constant 0 : i32
    %c0_i32_0 = arith.constant 0 : i32
    return %arg0, %c0_i32, %arg2 : i32, i32, i32
  }
  func.func @transform_1(%arg0: i32, %arg1: i32, %arg2: i32) -> (i32, i32) {
    %c0_i32 = arith.constant 0 : i32
    %c0_i32_0 = arith.constant 0 : i32
    return %arg1, %c0_i32 : i32, i32
  }
  func.func @transform_2(%arg0: i32, %arg1: i32, %arg2: i32) -> (i32, i32, i32) {
    %c0_i32 = arith.constant 0 : i32
    %c0_i32_0 = arith.constant 0 : i32
    return %arg0, %arg1, %c0_i32 : i32, i32, i32
  }
}

</mosaic_0001>

<bundles_post_ra>
// kernel: tpu_custom_call.1
= control target key start
LH: loop header
LB: loop body
LE: loop exit
PB: predicated region body
PF: predicated region fallthrough
CT: control target
= control target key end

     0   :  { %7 = vsyncpa [#allocation4], 0  ;;  %s679_s0 = inlined_call_operand.vmem [shape: bf16[2,36,64], index: 0, kind: input, shape index: {}]   ;;  %s680_s1 = inlined_call_operand.vmem [shape: bf16[8,36], index: 1, kind: input, shape index: {}]   ;;  %s681_s2 = inlined_call_operand.hbm [shape: f32[2,8,64], index: 2, kind: output, shape index: {}]  }
   0x1   :  { %9 = vsyncpa [#allocation4 + $0x1], 0  ;;  %s574_s9 = smov 0   ;;  %s576_s10 = smov 0  }
   0x2   :  { %s578_s11 = smov 0   ;;  %s580_s12 = smov 0  }
   0x3   :  { %s582_s13 = smov 0   ;;  %s584_s14 = smov 0  }
   0x4 LB: > { %s385_s15 = sadd.s32 4294967295, %s554_s14   ;;  %s386_s16 = sadd.s32 4294967294, %s554_s14   ;;  %s554_s14 = sphi %s584_s14, %s15_s14   ;;  %s550_s13 = sphi %s582_s13, %s688_s13   ;;  %s546_s12 = sphi %s580_s12, %s687_s12   ;;  %s542_s11 = sphi %s578_s11, %s686_s11   ;;  %s538_s10 = sphi %s576_s10, %s685_s10   ;;  %s534_s9 = sphi %s574_s9, %s684_s9  }
   0x5   : > { %s34_s17 = sadd.s32 1, %s550_s13  ;;  %s97_s18 = sadd.s32 1, %s542_s11 }
   0x6   : > { %p36_p0 = scmp.ge.s32.totalorder %s34_s17, 2  ;;  %p107_p1 = scmp.ne.s32.totalorder %s542_s11, %s538_s10 }
   0x7   : > { %p108_p2 = scmp.eq.s32.totalorder %s385_s15, 1  ;;  %p113_p3 = scmp.ne.s32.totalorder %s538_s10, %s534_s9 }
   0x8   : > { %s690_s17 = smov (%p36_p0, %s34_s17), 0  ;;  %p114_p5 = scmp.eq.s32.totalorder %s386_s16, 1 }
   0x9   : > { %p614_p4 = por %p108_p2, %p107_p1  ;;  %s92_s20 = ssub.s32 %s550_s13, %s690_s17 }
   0xa   : > { %p390_p6 = scmp.ge.s32.totalorder %s554_s14, 1  ;;  %p95_p7 = scmp.eq.s32.totalorder %s92_s20, 0 }
   0xb   : > { %p621_p8 = por %p114_p5, %p113_p3  ;;  %p150_p9 = scmp.lt.s32.totalorder %s554_s14, 3 }
   0xc   : > { %s627_s22 = scalar_select %p95_p7, %s542_s11, %s97_s18  }
   0xd   : > { %p151_p10 = pnand %p390_p6, %p150_p9 }
   0xe   : > { %p179_p11 = scmp.lt.s32.totalorder (!%p151_p10), %s546_s12, 1  ;;  %s176_s30 = sand.u32 (!%p151_p10), 1, %s538_s10  }
   0xf   : > { %154 = sbr.rel (%p151_p10) target bundleno = 550 (0x226), region = 28  ;;  %s391_s3 = sshll.u32 (!%p151_p10), %s176_s30, 3 }
  0x10   : > { %s398_s4 = sshll.u32 (!%p151_p10), %s546_s12, 7  ;;  %s178_s5 = scalar_lea.vmem (!%p151_p10), [#allocation3], %s391_s3 }
  0x11   : > { %s293_s6 = sshll.u32 (!%p151_p10), %s178_s5, 4  ;;  %s291_s15 = scalar_lea.hbm (!%p151_p10), %s681_s2, %s398_s4  ;;  %s294_s6 = int_to_ptr.vmem [resolvable:$true] %s293_s6 }
  0x12   : > { %s279_s16 = scalar_lea.sflag (!%p151_p10), [#allocation4], %s176_s30  ;;  %s478_s18 = scalar_lea.vmem (!%p151_p10), %s294_s6, 128 }
  0x13   : > { %p479_p12 = scmp.ne.s32.totalorder (!%p151_p10), %s294_s6, %s478_s18  ;;  %s558_s20 = smov (!%p151_p10), [#allocation3]  }
  0x14   : > { %v556_v0 = vmov 0.0   ;;  %vm557_vm0 = vmmov 0   ;;  %s180_s23 = scalar_select %p179_p11, %s546_s12, 1  ;;  %vm217_vm1 = vcmask 1041408   ;;  %v192_v5 = vld [vmem:[%s680_s1] sm:$0xf] }
  0x15   : > { %405 = vmatprep.subr.bf16.mxu0 %v556_v0  ;;  %411 = vmatprep.mubr.msk.bf16.mxu0 %vm557_vm0, %v556_v0  ;;  %vm213_vm2 = vcmask 293888   ;;  %vm261_vm3 = vcmask 523264   ;;  %p480_p13 = pnand %p479_p12, %p614_p4 }
  0x16   : > { %s415_s24 = smul.u32 20, %s180_s23  ;;  %s482_s23 = sshll.u32 %s558_s20, 4  ;;  %s483_s23 = int_to_ptr.vmem [resolvable:$false] %s482_s23 }
  0x17   : > { %p481_p0 = pneg %p480_p13  ;;  %s484_s12 = scalar_lea.vmem %s483_s23, 256 }
  0x18   : > { %s186_s27 = scalar_lea.vmem %s679_s0, %s415_s24  ;;  %p485_p1 = scmp.lt.s32.totalorder %s294_s6, %s483_s23 }
  0x19   : > { %v473_v1 = vld [vmem:[%s186_s27 + $0x10] ss:$0 sps:$4 sm:$0x33]   ;;  %v474_v3 = vld [vmem:[%s186_s27 + $0x8] sm:$0xff]   ;;  %v475_v4 = vld [vmem:[%s186_s27] sm:$0xff]   ;;  %p486_p2 = scmp.lt.s32.totalorder %s484_s12, %s478_s18 }
  0x1a   : > { %v219_v2 = vsel %vm217_vm1, %v473_v1, 0 }
  0x1b   : > { %406 = vmatpush3.bf16.msra.mxu0 %v219_v2  ;;  %p487_p3 = por %p486_p2, %p485_p1 }
  0x1c   : > { %407 = vmatprep.subr.bf16.mxu0 %v556_v0 }
  0x1d   : > { %p488_p5 = pnand %p487_p3, %p481_p0 }
  0x1f   : > { %408 = vmatpush3.bf16.msra.mxu0 %v474_v3 }
  0x20   : > { %409 = vmatprep.subr.bf16.mxu0 %v556_v0 }
  0x23   : > { %410 = vmatpush3.bf16.msra.mxu0 %v475_v4 }
  0x26   : > { %412 = vmatmul.mubr.msk.bf16.vlgmr.msra.gmra.mxu0 %vm213_vm2, %v192_v5 }
  0xe6   : > { %v255_v6 = vpop.f32.mrf.mxu0 }
  0xe7   : > { %v262_v7 = vsel %vm261_vm3, %v255_v6, 0.0 }
  0xe8   : > { %263 = vadd.xlane.f32.xlu0 %v262_v7  ;;  %v413_v8 = vpop.f32.mrf.mxu0 }
  0xea   : > { %v258_v9 = vpop.f32.mrf.mxu0 }
  0xec   : > { %v414_v10 = vpop.f32.mrf.mxu0 }
 0x171   : > { %v264_v11 = vpop.xlane.xlu0 %263 }
 0x172   : > { %v266_v12 = vmul.f32 0.015625, %v264_v11 }
 0x174   : > { %v267_v13 = vsub.f32 %v255_v6, %v266_v12 }
 0x176   : > { %v268_v14 = vmul.f32 %v267_v13, %v267_v13 }
 0x178   : > { %v269_v15 = vsel %vm261_vm3, %v268_v14, 0.0 }
 0x179   : > { %270 = vadd.xlane.f32.xlu0 %v269_v15 }
 0x202   : > { %v271_v16 = vpop.xlane.xlu0 %270 }
 0x203   : > { %v272_v17 = vmul.f32 0.015625, %v271_v16 }
 0x205   : > { %v273_v18 = vadd.f32 1e-05, %v272_v17 }
 0x207   : > { %476 = vrsqrt.f32 %v273_v18 }
 0x214   : > { %v477_v19 = vpop.eup %476 }
 0x215   : > { %v275_v20 = vmul.f32 %v477_v19, %v267_v13 }
 0x217   : > { %v276_v21 = vmax.f32 %v275_v20, 0.0 }
 0x219   : > { %277 = vst.msk [vmem:[%s178_s5] sm:$0xff] %vm261_vm3, %v276_v21 }
 0x21a   : > { %491 = shalt.err (!%p488_p5)
}
 0x21b   : > { %s492_s24 = scalar_lea.hbm %s291_s15, 128  ;;  %s496_s27 = scalar_lea.hbm %s681_s2, 256 }
 0x21c   : > { %p493_p6 = scmp.ne.s32.totalorder %s291_s15, %s492_s24  ;;  %p497_p10 = scmp.lt.s32.totalorder %s291_s15, %s681_s2 }
 0x21d   : > { %p498_p11 = scmp.lt.s32.totalorder %s496_s27, %s492_s24 }
 0x21e   : > { %p494_p7 = pnand %p493_p6, %p614_p4 }
 0x21f   : > { %p499_p12 = por %p498_p11, %p497_p10 }
 0x220   : > { %p495_p9 = pneg %p494_p7 }
 0x222   : > { %p500_p13 = pnand %p499_p12, %p495_p9 }
 0x224   : > { %503 = shalt.err (!%p500_p13)
}
 0x225   : > { %416 = dma.vmem_to_hbm [thread:$0]  (%p614_p4), %s294_s6, 128, %s291_s15, %s279_s16  }
 0x226 PF: > { %p422_p0 = scmp.ge.s32.totalorder %s554_s14, 2  ;;  %s305_s30 = sand.u32 1, %s534_s9  }
 0x227   : > { %s306_s3 = scalar_lea.sflag [#allocation4], %s305_s30 }
 0x228   : > { %p419_p1 = pnand %p422_p0, %p621_p8 }
 0x22a   : > { %p420_p2 = pneg %p419_p1 }
 0x22c   : > { %529 = dma.done.wait (%p420_p2), %s306_s3, 128  }
 0x22d   : > { %531 = vsyncadd (%p420_p2), %s306_s3, 4294967168  ;;  %s15_s14 = sadd.s32 1, %s554_s14   ;;  %s684_s9 = smov %s538_s10 }
 0x22e   : > { %p12_p3 = scmp.ge.s32.totalorder %s15_s14, 4   ;;  %s685_s10 = smov %s542_s11 }
 0x22f   : > { %s686_s11 = smov %s627_s22  ;;  %s687_s12 = smov %s550_s13 }
 0x230   : > { %s688_s13 = smov %s690_s17  ;;  %14 = sbr.rel (!%p12_p3) target bundleno = 4 (0x4), region = 66 }
 0x235   :  { %311 = vsyncpa [#allocation4], 1 }
 0x236   :  { %313 = vsyncpa [#allocation4 + $0x1], 1 }

</bundles_post_ra>
